<compile_context>
chip_gen: v7x
topology: tpu7x:2x2x1
jax: 0.10.0
libtpu: 0.0.40
codegen_flags: <defaults>
</compile_context>

<pallas_src>
import jax
import jax.numpy as jnp
from jax.experimental import pallas as pl
from jax.experimental.pallas import tpu as pltpu

_LANES = 128
_MAX_ROW_BLOCK = 512  # 512*128*4B = 256 KiB per output block (fits all gens)


def _naive_bias_kernel(w_ref, b_ref, o_ref):
    # Linear(1, 1) applied to an all-zeros input: y = 0 * w + b.
    w = w_ref[0]                       # SMEM scalar weight
    b = b_ref[0]                       # SMEM scalar bias
    val = w * 0.0 + b                  # == b (kept for semantic fidelity)
    o_ref[...] = jnp.full(o_ref.shape, val, dtype=o_ref.dtype)


def naive_linear_on_zeros(weight, bias, bs):
    """Equivalent of Linear(1,1)(zeros(bs,1)).squeeze(1) -> (bs,) f32."""
    bs_pad = ((bs + _LANES - 1) // _LANES) * _LANES
    rows = bs_pad // _LANES
    row_block = min(rows, _MAX_ROW_BLOCK)
    grid = (pl.cdiv(rows, row_block),)

    out = pl.pallas_call(
        _naive_bias_kernel,
        out_shape=jax.ShapeDtypeStruct((rows, _LANES), jnp.float32),
        grid=grid,
        in_specs=[
            pl.BlockSpec(memory_space=pltpu.MemorySpace.SMEM),  # weight (1,)
            pl.BlockSpec(memory_space=pltpu.MemorySpace.SMEM),  # bias   (1,)
        ],
        out_specs=pl.BlockSpec((row_block, _LANES), lambda i: (i, 0)),
        compiler_params=pltpu.CompilerParams(
            dimension_semantics=("parallel",)),
    )(weight.reshape(1), bias.reshape(1))

    return out.reshape(bs_pad)[:bs]     # (bs,)


class NaivePallas:
    """JAX/Pallas port of the PyTorch `Naive` module."""

    def __init__(self, key):
        # nn.Linear(1, 1): weight (1,1), bias (1,), default uniform(-1, 1)
        # init (1/sqrt(in_features) == 1).
        kw, kb = jax.random.split(key)
        self.weight = jax.random.uniform(
            kw, (1, 1), dtype=jnp.float32, minval=-1.0, maxval=1.0)
        self.bias = jax.random.uniform(
            kb, (1,), dtype=jnp.float32, minval=-1.0, maxval=1.0)

    def __call__(self, h0, x, edges, edge_attr, node_mask, edge_mask, n_nodes):
        node_mask = node_mask.reshape(-1, n_nodes)
        bs, _ = node_mask.shape
        # x = zeros(bs, 1); Linear(1,1)(x).squeeze(1)  ==  bias broadcast
        return naive_linear_on_zeros(self.weight, self.bias, bs)   # (bs,)


if __name__ == "__main__":
    key = jax.random.PRNGKey(0)
    k0, k1, k2, kmod = jax.random.split(key, 4)

    bs, n_nodes, feat_dim = 2, 8, 4
    n_edges = n_nodes * (n_nodes - 1) * bs

    h0 = jax.random.normal(k0, (bs * n_nodes, feat_dim), dtype=jnp.float32)
    x_coords = jax.random.normal(k1, (bs * n_nodes, 3), dtype=jnp.float32)
    rows = jnp.arange(n_edges, dtype=jnp.int32) % (bs * n_nodes)
    cols = (jnp.arange(n_edges, dtype=jnp.int32) + 1) % (bs * n_nodes)
    edges = [rows, cols]
    edge_attr = jax.random.normal(k2, (n_edges, 2), dtype=jnp.float32)
    node_mask = jnp.ones((bs * n_nodes, 1), dtype=jnp.float32)
    edge_mask = jnp.ones((n_edges, 1), dtype=jnp.float32)

    model = NaivePallas(kmod)
    out = model(h0, x_coords, edges, edge_attr, node_mask, edge_mask, n_nodes)
    out = jax.block_until_ready(out)

    # Reference check: output == bias broadcast to (bs,)
    expected = jnp.broadcast_to(model.bias, (bs,))
    assert out.shape == (bs,), out.shape
    assert jnp.allclose(out, expected, atol=1e-6), (out, expected)

    print("KERNEL_OK")
</pallas_src>

<mosaic_0001>
module attributes {stable_mosaic.version = 11 : i64} {
  func.func @_naive_bias_kernel(%arg0: i32, %arg1: memref<1xf32, #tpu.memory_space<smem>>, %arg2: memref<1xf32, #tpu.memory_space<smem>>, %arg3: memref<1x128xf32, #tpu.memory_space<vmem>>) attributes {dimension_semantics = [#tpu.dimension_semantics<parallel>], iteration_bounds = array<i64: 1>, scalar_prefetch = 0 : i64, scratch_operands = 0 : i64, tpu.core_type = #tpu.core_type<tc>, window_params = [{transform_indices = @transform_0, window_bounds = array<i64: 1>}, {transform_indices = @transform_1, window_bounds = array<i64: 1>}, {transform_indices = @transform_2, window_bounds = array<i64: 1, 128>}]} {
    %c0 = arith.constant 0 : index
    %0 = memref.load %arg1[%c0] : memref<1xf32, #tpu.memory_space<smem>>
    %c0_0 = arith.constant 0 : index
    %1 = memref.load %arg2[%c0_0] : memref<1xf32, #tpu.memory_space<smem>>
    %cst = arith.constant 0.000000e+00 : f32
    %2 = arith.mulf %0, %cst : f32
    %3 = arith.addf %2, %1 : f32
    %4 = vector.broadcast %3 : f32 to vector<1x128xf32>
    %c0_1 = arith.constant 0 : index
    %c0_2 = arith.constant 0 : index
    %5 = vector.load %arg3[%c0_1, %c0_2] : memref<1x128xf32, #tpu.memory_space<vmem>>, vector<1x128xf32>
    tpu.vector_store %arg3[%c0_1, %c0_2], %4 {strides = array<i32>} : memref<1x128xf32, #tpu.memory_space<vmem>>, vector<1x128xf32>,
    return
  }
  func.func @transform_0(%arg0: i32) -> i32 {
    %c0_i32 = arith.constant 0 : i32
    %c0_i32_0 = arith.constant 0 : i32
    return %c0_i32 : i32
  }
  func.func @transform_1(%arg0: i32) -> i32 {
    %c0_i32 = arith.constant 0 : i32
    %c0_i32_0 = arith.constant 0 : i32
    return %c0_i32 : i32
  }
  func.func @transform_2(%arg0: i32) -> (i32, i32) {
    %c0_i32 = arith.constant 0 : i32
    %c0_i32_0 = arith.constant 0 : i32
    return %arg0, %c0_i32 : i32, i32
  }
}

</mosaic_0001>

<bundles_post_ra>
// kernel: tpu_custom_call.1
= control target key start
LH: loop header
LB: loop body
LE: loop exit
PB: predicated region body
PF: predicated region fallthrough
CT: control target
= control target key end

     0   :  { %s93_s0 = inlined_call_operand.<no memory space> [shape: f32[1], index: 0, kind: input, shape index: {}]   ;;  %s94_s1 = inlined_call_operand.<no memory space> [shape: f32[1], index: 1, kind: input, shape index: {}]   ;;  %s95_s2 = inlined_call_operand.hbm [shape: f32[1,128], index: 2, kind: output, shape index: {}]  }
   0x1   :  { %s16_s11 = smul.f32 0.0, %s93_s0 }
   0x2   :  { %9 = vsyncpa [#allocation5], 0  ;;  %s59_s12 = smov [#allocation4]  }
   0x3   :  { %s26_s13 = sshll.u32 %s59_s12, 4  ;;  %s17_s16 = sadd.f32 %s16_s11, %s94_s1  ;;  %s27_s13 = int_to_ptr.vmem [resolvable:$true] %s26_s13 }
   0x4   :  { %s35_s17 = scalar_lea.vmem %s27_s13, 16  ;;  %s39_s18 = scalar_lea.vmem %s27_s13, 32 }
   0x5   :  { %v18_v0 = vstv %s17_s16  ;;  %p36_p0 = scmp.ne.s32.totalorder %s27_s13, %s35_s17  ;;  %p40_p1 = scmp.lt.s32.totalorder %s27_s13, %s27_s13 }
   0x6   :  { %19 = vst [vmem:[#allocation4] sm:$0x1] %v18_v0  ;;  %p41_p2 = scmp.lt.s32.totalorder %s39_s18, %s35_s17 }
   0x8   :  { %p42_p3 = por %p41_p2, %p40_p1 }
   0xa   :  { %p43_p4 = pnand %p42_p3, %p36_p0 }
   0xc   :  { %46 = shalt.err (!%p43_p4)
}
   0xd   :  { %s47_s20 = scalar_lea.hbm %s95_s2, 16 }
   0xe   :  { %p48_p5 = scmp.ne.s32.totalorder %s95_s2, %s47_s20  ;;  %p51_p6 = scmp.lt.u32.totalorder %s47_s20, %s95_s2 }
  0x10   :  { %p53_p7 = pnand %p51_p6, %p48_p5 }
  0x12   :  { %56 = shalt.err (!%p53_p7)
}
  0x13   :  { %29 = dma.vmem_to_hbm [thread:$0]  %s27_s13, 16, %s95_s2, [#allocation5]  }
  0x14   :  { %57 = dma.done.wait [#allocation5], 16  }
  0x15   :  { %58 = vsyncadd [#allocation5], 4294967280 }
  0x16   :  { %33 = vsyncpa [#allocation5], 1 }

</bundles_post_ra>
